<compile_context>
chip_gen: v6e
topology: v6e:2x2x1
jax: 0.10.0
libtpu: 0.0.40
codegen_flags: <defaults>
</compile_context>

<pallas_src>
import jax
import jax.numpy as jnp
from jax.experimental import pallas as pl
from jax.experimental.pallas import tpu as pltpu

EPS = 1e-5
LANE = 128


def _round_up(x, m):
    return (x + m - 1) // m * m


def _pad2d(a, rows, cols):
    return jnp.pad(a, ((0, rows - a.shape[0]), (0, cols - a.shape[1])))


# ---------------------------------------------------------------------------
# Pallas kernels: tiled matmul with fused bias / residual-add / ReLU epilogue
# ---------------------------------------------------------------------------
def _matmul_bias_relu_kernel(p_ref, w_ref, b_ref, o_ref):
    # out = relu(P @ W + bias)        (BN scale already folded into W)
    acc = jnp.dot(p_ref[...], w_ref[...], preferred_element_type=jnp.float32)
    o_ref[...] = jnp.maximum(acc + b_ref[...], 0.0)


def _matmul_bias_add_relu_kernel(p_ref, w_ref, b_ref, r_ref, o_ref):
    # out = relu(P @ W + bias + residual)   (identity shortcut: vector add only)
    acc = jnp.dot(p_ref[...], w_ref[...], preferred_element_type=jnp.float32)
    o_ref[...] = jnp.maximum(acc + b_ref[...] + r_ref[...], 0.0)


def _pick_tiles(m, cout_pad):
    # M tile: multiple of 8, capped so double-buffered bf16 tiles stay far under
    # the 32 MiB scoped VMEM limit even on v7x.  N tile: 256 when the padded
    # Cout allows it (v6e/v7x 256-wide MXU), else 128 (v5e native width).
    tile_m = min(256, _round_up(m, 8))
    tile_n = 256 if cout_pad % 256 == 0 else 128
    return tile_m, tile_n


def _tiled_matmul_epilogue(p, w, b, residual=None):
    """p (M,K) bf16, w (K,Cout) bf16, b (1,Cout) f32, residual (M,Cout) f32."""
    M, K = p.shape
    Cout = w.shape[1]
    tile_m, tile_n = _pick_tiles(M, Cout)
    assert M % tile_m == 0 and Cout % tile_n == 0 and K % LANE == 0

    grid = (Cout // tile_n, M // tile_m)  # M (weight-invariant) axis innermost
    in_specs = [
        pl.BlockSpec((tile_m, K), lambda j, i: (i, 0)),   # P rows
        pl.BlockSpec((K, tile_n), lambda j, i: (0, j)),   # W cols (reused over i)
        pl.BlockSpec((1, tile_n), lambda j, i: (0, j)),   # bias
    ]
    args = [p, w, b]
    kernel = _matmul_bias_relu_kernel
    if residual is not None:
        in_specs.append(pl.BlockSpec((tile_m, tile_n), lambda j, i: (i, j)))
        args.append(residual)
        kernel = _matmul_bias_add_relu_kernel

    return pl.pallas_call(
        kernel,
        out_shape=jax.ShapeDtypeStruct((M, Cout), jnp.float32),
        grid=grid,
        in_specs=in_specs,
        out_specs=pl.BlockSpec((tile_m, tile_n), lambda j, i: (i, j)),
        compiler_params=pltpu.CompilerParams(
            dimension_semantics=("parallel", "parallel"),
            vmem_limit_bytes=32 * 1024 * 1024),
    )(*args)


def fused_conv_matmul(p, w, bias, residual=None):
    """Pad to MXU/lane-aligned shapes, cast operands to bf16, run the kernel."""
    M, K = p.shape
    Cout = w.shape[1]
    K_pad = _round_up(K, LANE)
    C_pad = _round_up(Cout, LANE)
    tile_m, _ = _pick_tiles(M, C_pad)
    M_pad = _round_up(M, tile_m)

    p_p = _pad2d(p, M_pad, K_pad).astype(jnp.bfloat16)
    w_p = _pad2d(w, K_pad, C_pad).astype(jnp.bfloat16)
    b_p = _pad2d(bias.reshape(1, -1).astype(jnp.float32), 1, C_pad)
    r_p = None
    if residual is not None:
        r_p = _pad2d(residual.astype(jnp.float32), M_pad, C_pad)

    out = _tiled_matmul_epilogue(p_p, w_p, b_p, r_p)
    return out[:M, :Cout]


# ---------------------------------------------------------------------------
# Host-side glue (layout plumbing only)
# ---------------------------------------------------------------------------
def im2col(x_nhwc, k, stride, pad):
    """(N,H,W,C) -> ((N*Ho*Wo, k*k*C), (N,Ho,Wo)); patch order (kh, kw, cin)."""
    N, H, W, C = x_nhwc.shape
    xp = jnp.pad(x_nhwc, ((0, 0), (pad, pad), (pad, pad), (0, 0)))
    Ho = (H + 2 * pad - k) // stride + 1
    Wo = (W + 2 * pad - k) // stride + 1
    patches = []
    for kh in range(k):
        for kw in range(k):
            patches.append(
                xp[:, kh:kh + Ho * stride:stride, kw:kw + Wo * stride:stride, :])
    p = jnp.concatenate(patches, axis=-1)          # (N, Ho, Wo, k*k*C)
    return p.reshape(N * Ho * Wo, k * k * C), (N, Ho, Wo)


def fold_bn(gamma, beta, mean, var, eps=EPS):
    scale = gamma / jnp.sqrt(var + eps)
    bias = beta - mean * scale
    return scale.astype(jnp.float32), bias.astype(jnp.float32)


def weight_matrix_scaled(w_oihw, scale):
    """(Cout,Cin,kh,kw) -> (kh*kw*Cin, Cout) with BN scale folded into columns."""
    w = jnp.transpose(w_oihw, (2, 3, 1, 0)).reshape(-1, w_oihw.shape[0])
    return (w * scale[None, :]).astype(jnp.float32)


def residual_block(x_nchw, params, stride):
    """Forward pass of the ResidualBlock.  x is NCHW (PyTorch convention)."""
    in_planes = x_nchw.shape[1]
    planes = params["conv1_w"].shape[0]

    x = jnp.transpose(x_nchw, (0, 2, 3, 1)).astype(jnp.float32)  # NHWC

    # --- conv1 (3x3, stride) + bn1 + relu ------------------------------------
    s1, b1 = fold_bn(params["bn1_g"], params["bn1_b"], params["bn1_m"], params["bn1_v"])
    p1, (N, Ho, Wo) = im2col(x, 3, stride, 1)
    w1 = weight_matrix_scaled(params["conv1_w"], s1)
    out1 = fused_conv_matmul(p1, w1, b1)                      # (M, planes) f32
    out1_nhwc = out1.reshape(N, Ho, Wo, planes)

    # --- conv2 (3x3, stride 1) + bn2, fused with shortcut + add + relu -------
    s2, b2 = fold_bn(params["bn2_g"], params["bn2_b"], params["bn2_m"], params["bn2_v"])
    p2, _ = im2col(out1_nhwc, 3, 1, 1)                        # (M, 9*planes)
    w2 = weight_matrix_scaled(params["conv2_w"], s2)

    if stride != 1 or in_planes != planes:
        # Projection shortcut: one fused matmul via K-concatenation.
        ss, bs = fold_bn(params["sc_g"], params["sc_b"], params["sc_m"], params["sc_v"])
        ps, _ = im2col(x, 1, stride, 0)                       # (M, Cin)
        ws = weight_matrix_scaled(params["sc_w"], ss)         # (Cin, planes)
        p_cat = jnp.concatenate([p2, ps], axis=1)
        w_cat = jnp.concatenate([w2, ws], axis=0)
        out = fused_conv_matmul(p_cat, w_cat, b2 + bs)
    else:
        # Identity shortcut: residual added in the kernel epilogue (no matmul).
        residual = x.reshape(N * Ho * Wo, in_planes)
        out = fused_conv_matmul(p2, w2, b2, residual=residual)

    return jnp.transpose(out.reshape(N, Ho, Wo, planes), (0, 3, 1, 2))  # NCHW


# ---------------------------------------------------------------------------
# Pure-JAX reference (for correctness check)
# ---------------------------------------------------------------------------
def _ref_bn(x, g, b, m, v):
    g, b, m, v = (t[None, :, None, None] for t in (g, b, m, v))
    return g * (x - m) / jnp.sqrt(v + EPS) + b


def _ref_conv(x, w, stride, pad):
    return jax.lax.conv_general_dilated(
        x, w, (stride, stride), ((pad, pad), (pad, pad)),
        dimension_numbers=("NCHW", "OIHW", "NCHW"))


def residual_block_ref(x, p, stride):
    in_planes = x.shape[1]
    planes = p["conv1_w"].shape[0]
    out = jax.nn.relu(_ref_bn(_ref_conv(x, p["conv1_w"], stride, 1),
                              p["bn1_g"], p["bn1_b"], p["bn1_m"], p["bn1_v"]))
    out = _ref_bn(_ref_conv(out, p["conv2_w"], 1, 1),
                  p["bn2_g"], p["bn2_b"], p["bn2_m"], p["bn2_v"])
    if stride != 1 or in_planes != planes:
        sc = _ref_bn(_ref_conv(x, p["sc_w"], stride, 0),
                     p["sc_g"], p["sc_b"], p["sc_m"], p["sc_v"])
    else:
        sc = x
    return jax.nn.relu(out + sc)


# ---------------------------------------------------------------------------
# Deterministic parameter init + run
# ---------------------------------------------------------------------------
def make_params(key, in_planes, planes, stride):
    ks = jax.random.split(key, 12)
    p = {
        "conv1_w": 0.1 * jax.random.normal(ks[0], (planes, in_planes, 3, 3), jnp.float32),
        "bn1_g": 1.0 + 0.1 * jax.random.normal(ks[1], (planes,), jnp.float32),
        "bn1_b": 0.1 * jax.random.normal(ks[2], (planes,), jnp.float32),
        "bn1_m": 0.1 * jax.random.normal(ks[3], (planes,), jnp.float32),
        "bn1_v": jnp.abs(jax.random.normal(ks[4], (planes,), jnp.float32)) + 0.5,
        "conv2_w": 0.1 * jax.random.normal(ks[5], (planes, planes, 3, 3), jnp.float32),
        "bn2_g": 1.0 + 0.1 * jax.random.normal(ks[6], (planes,), jnp.float32),
        "bn2_b": 0.1 * jax.random.normal(ks[7], (planes,), jnp.float32),
        "bn2_m": 0.1 * jax.random.normal(ks[8], (planes,), jnp.float32),
        "bn2_v": jnp.abs(jax.random.normal(ks[9], (planes,), jnp.float32)) + 0.5,
    }
    if stride != 1 or in_planes != planes:
        ks2 = jax.random.split(ks[10], 5)
        p.update({
            "sc_w": 0.1 * jax.random.normal(ks[11], (planes, in_planes, 1, 1), jnp.float32),
            "sc_g": 1.0 + 0.1 * jax.random.normal(ks2[0], (planes,), jnp.float32),
            "sc_b": 0.1 * jax.random.normal(ks2[1], (planes,), jnp.float32),
            "sc_m": 0.1 * jax.random.normal(ks2[2], (planes,), jnp.float32),
            "sc_v": jnp.abs(jax.random.normal(ks2[3], (planes,), jnp.float32)) + 0.5,
        })
    return p


def _run_case(key, in_planes, planes, stride, N=2, H=16, W=16):
    kx, kp = jax.random.split(key)
    x = jax.random.normal(kx, (N, in_planes, H, W), jnp.float32)
    params = make_params(kp, in_planes, planes, stride)

    out = jax.block_until_ready(residual_block(x, params, stride))
    ref = jax.block_until_ready(residual_block_ref(x, params, stride))

    assert out.shape == ref.shape == (N, planes, H // stride, W // stride)
    err = float(jnp.max(jnp.abs(out - ref)))
    # bf16 matmul operands with f32 accumulation -> ~1e-2 level tolerance.
    assert jnp.allclose(out, ref, rtol=2e-2, atol=2e-2), err


if __name__ == "__main__":
    key = jax.random.PRNGKey(0)
    k1, k2 = jax.random.split(key)
    # projection-shortcut case (stride 2, channel change)
    _run_case(k1, in_planes=4, planes=8, stride=2)
    # identity-shortcut case (stride 1, same channels) -> residual-add epilogue
    _run_case(k2, in_planes=8, planes=8, stride=1)
    print("KERNEL_OK")
</pallas_src>

<mosaic_0001>
module attributes {stable_mosaic.version = 11 : i64} {
  func.func @_matmul_bias_relu_kernel(%arg0: i32, %arg1: i32, %arg2: memref<128x128xbf16, #tpu.memory_space<vmem>>, %arg3: memref<128x128xbf16, #tpu.memory_space<vmem>>, %arg4: memref<1x128xf32, #tpu.memory_space<vmem>>, %arg5: memref<128x128xf32, #tpu.memory_space<vmem>>) attributes {dimension_semantics = [#tpu.dimension_semantics<parallel>, #tpu.dimension_semantics<parallel>], iteration_bounds = array<i64: 1, 1>, scalar_prefetch = 0 : i64, scratch_operands = 0 : i64, tpu.core_type = #tpu.core_type<tc>, window_params = [{transform_indices = @transform_0, window_bounds = array<i64: 128, 128>}, {transform_indices = @transform_1, window_bounds = array<i64: 128, 128>}, {transform_indices = @transform_2, window_bounds = array<i64: 1, 128>}, {transform_indices = @transform_3, window_bounds = array<i64: 128, 128>}]} {
    %c0 = arith.constant 0 : index
    %c0_0 = arith.constant 0 : index
    %0 = vector.load %arg2[%c0, %c0_0] : memref<128x128xbf16, #tpu.memory_space<vmem>>, vector<128x128xbf16>
    %c0_1 = arith.constant 0 : index
    %c0_2 = arith.constant 0 : index
    %1 = vector.load %arg3[%c0_1, %c0_2] : memref<128x128xbf16, #tpu.memory_space<vmem>>, vector<128x128xbf16>
    %cst = arith.constant dense<0.000000e+00> : vector<128x128xf32>
    %2 = tpu.matmul %0, %1, %cst {dimension_numbers = #tpu.dot_dimension_numbers<[1], [0], [0], [1], [0, 0, 1, 1], [], []>} : vector<128x128xbf16>, vector<128x128xbf16>, vector<128x128xf32> -> vector<128x128xf32>
    %c0_3 = arith.constant 0 : index
    %c0_4 = arith.constant 0 : index
    %3 = vector.load %arg4[%c0_3, %c0_4] : memref<1x128xf32, #tpu.memory_space<vmem>>, vector<1x128xf32>
    %4 = vector.broadcast %3 : vector<1x128xf32> to vector<128x128xf32>
    %5 = arith.addf %2, %4 : vector<128x128xf32>
    %cst_5 = arith.constant 0.000000e+00 : f32
    %6 = vector.broadcast %cst_5 : f32 to vector<128x128xf32>
    %7 = arith.maximumf %5, %6 : vector<128x128xf32>
    %c0_6 = arith.constant 0 : index
    %c0_7 = arith.constant 0 : index
    %8 = vector.load %arg5[%c0_6, %c0_7] : memref<128x128xf32, #tpu.memory_space<vmem>>, vector<128x128xf32>
    tpu.vector_store %arg5[%c0_6, %c0_7], %7 {strides = array<i32>} : memref<128x128xf32, #tpu.memory_space<vmem>>, vector<128x128xf32>,
    return
  }
  func.func @transform_0(%arg0: i32, %arg1: i32) -> (i32, i32) {
    %c0_i32 = arith.constant 0 : i32
    %c0_i32_0 = arith.constant 0 : i32
    return %arg1, %c0_i32 : i32, i32
  }
  func.func @transform_1(%arg0: i32, %arg1: i32) -> (i32, i32) {
    %c0_i32 = arith.constant 0 : i32
    %c0_i32_0 = arith.constant 0 : i32
    return %c0_i32, %arg0 : i32, i32
  }
  func.func @transform_2(%arg0: i32, %arg1: i32) -> (i32, i32) {
    %c0_i32 = arith.constant 0 : i32
    %c0_i32_0 = arith.constant 0 : i32
    return %c0_i32, %arg0 : i32, i32
  }
  func.func @transform_3(%arg0: i32, %arg1: i32) -> (i32, i32) {
    %c0_i32 = arith.constant 0 : i32
    return %arg1, %arg0 : i32, i32
  }
}

</mosaic_0001>

<bundles_post_ra>
// kernel: tpu_custom_call.1
= control target key start
LH: loop header
LB: loop body
LE: loop exit
PB: predicated region body
PF: predicated region fallthrough
CT: control target
= control target key end

     0   :  { %8 = vsyncpa [#allocation3], 0  ;;  %s535_s0 = inlined_call_operand.hbm [shape: bf16[128,128], index: 0, kind: input, shape index: {}]   ;;  %s536_s1 = inlined_call_operand.hbm [shape: bf16[128,128], index: 1, kind: input, shape index: {}]   ;;  %s537_s2 = inlined_call_operand.vmem [shape: f32[1,128], index: 2, kind: input, shape index: {}]   ;;  %s538_s3 = inlined_call_operand.hbm [shape: f32[128,128], index: 3, kind: output, shape index: {}]  }
   0x1   :  { %9 = vsyncpa [#allocation6], 0 }
   0x2   :  { %10 = vsyncpa [#allocation4], 0  ;;  %s496_s12 = smov [#allocation2]  }
   0x3   :  { %s16_s13 = sshll.u32 %s496_s12, 4  ;;  %s17_s13 = int_to_ptr.vmem [resolvable:$true] %s16_s13 }
   0x4   :  { %s438_s14 = scalar_lea.vmem %s17_s13, 1024  ;;  %p443_p1 = scmp.lt.s32.totalorder %s17_s13, %s17_s13 }
   0x5   :  { %p439_p0 = scmp.ne.s32.totalorder %s17_s13, %s438_s14  ;;  %p444_p2 = scmp.lt.s32.totalorder %s438_s14, %s438_s14 }
   0x7   :  { %p445_p3 = por %p444_p2, %p443_p1 }
   0x9   :  { %p446_p4 = pnand %p445_p3, %p439_p0 }
   0xb   :  { %449 = shalt.err (!%p446_p4)
}
   0xc   :  { %s497_s15 = smov 64   ;;  %s498_s16 = smov 4  }
   0xd   :  { %22 = dma.hbm_to_vmem [thread:$0]  %s535_s0, 1024, %s17_s13, [#allocation3], %s497_s15, %s497_s15, %s498_s16  }
   0xe   :  { %s499_s19 = smov [#allocation5]  }
   0xf   :  { %s28_s20 = sshll.u32 %s499_s19, 4  ;;  %s29_s20 = int_to_ptr.vmem [resolvable:$true] %s28_s20 }
  0x10   :  { %s458_s21 = scalar_lea.vmem %s29_s20, 1024  ;;  %p463_p6 = scmp.lt.s32.totalorder %s29_s20, %s29_s20 }
  0x11   :  { %p459_p5 = scmp.ne.s32.totalorder %s29_s20, %s458_s21  ;;  %p464_p7 = scmp.lt.s32.totalorder %s458_s21, %s458_s21 }
  0x13   :  { %p465_p8 = por %p464_p7, %p463_p6 }
  0x15   :  { %p466_p9 = pnand %p465_p8, %p459_p5 }
  0x17   :  { %469 = shalt.err (!%p466_p9)
}
  0x18   :  { %34 = dma.hbm_to_vmem [thread:$0]  %s536_s1, 1024, %s29_s20, [#allocation6], %s497_s15, %s497_s15, %s498_s16  }
  0x19   :  { %490 = dma.done.wait [#allocation3], 1024  }
  0x1a   :  { %491 = vsyncadd [#allocation3], 4294966272 }
  0x1b   :  { %492 = dma.done.wait [#allocation6], 1024  }
  0x1c   :  { %493 = vsyncadd [#allocation6], 4294966272  ;;  %v414_v0 = vld [vmem:[#allocation5 + $0x38] sm:$0xff]   ;;  %v415_v1 = vld [vmem:[#allocation5 + $0x30] sm:$0xff]  }
  0x1d   :  { %359 = vmatprep.subr.bf16.mxu0 %v414_v0  ;;  %391 = vmatprep.subr.bf16.mxu1 %v414_v0  ;;  %v416_v2 = vld [vmem:[#allocation5 + $0x28] sm:$0xff]   ;;  %v417_v3 = vld [vmem:[#allocation5 + $0x20] sm:$0xff]   ;;  %v418_v6 = vld [vmem:[#allocation5 + $0x18] sm:$0xff]  }
  0x1e   :  { %360 = vmatpush3.bf16.msra.mxu0 %v414_v0  ;;  %399 = vmatpush3.bf16.msra.mxu1 %v414_v0  ;;  %v422_v4 = vld [vmem:[#allocation2] sm:$0xff]   ;;  %v419_v7 = vld [vmem:[#allocation5 + $0x10] sm:$0xff]   ;;  %v420_v8 = vld [vmem:[#allocation5 + $0x8] sm:$0xff]  }
  0x1f   :  { %361 = vmatprep.subr.bf16.mxu0 %v415_v1  ;;  %392 = vmatprep.subr.bf16.mxu1 %v415_v1  ;;  %v423_v5 = vld [vmem:[#allocation2 + $0x20] sm:$0xff]   ;;  %v424_v10 = vld [vmem:[#allocation2 + $0x8] sm:$0xff]   ;;  %v426_v12 = vld [vmem:[#allocation2 + $0x10] sm:$0xff]  }
  0x20   :  { %375 = vmatprep.mubr.bf16.mxu0 %v422_v4  ;;  %383 = vmatprep.mubr.bf16.mxu1 %v423_v5  ;;  %v421_v9 = vld [vmem:[#allocation5] sm:$0xff]   ;;  %v425_v11 = vld [vmem:[#allocation2 + $0x28] sm:$0xff]   ;;  %v427_v13 = vld [vmem:[#allocation2 + $0x30] sm:$0xff]  }
  0x21   :  { %v428_v14 = vld [vmem:[#allocation2 + $0x18] sm:$0xff]   ;;  %v326_v16 = vld [vmem:[%s537_s2] ss:$0 sm:$0xff]  ;;  %s500_s2 = smov [#allocation7]  }
  0x22   :  { %362 = vmatpush3.bf16.msra.mxu0 %v415_v1  ;;  %400 = vmatpush3.bf16.msra.mxu1 %v415_v1  ;;  %v429_v15 = vld [vmem:[#allocation2 + $0x38] sm:$0xff]   ;;  %s313_s24 = sshll.u32 %s500_s2, 4  ;;  %s314_s24 = int_to_ptr.vmem [resolvable:$true] %s313_s24 }
  0x23   :  { %363 = vmatprep.subr.bf16.mxu0 %v416_v2  ;;  %393 = vmatprep.subr.bf16.mxu1 %v416_v2  ;;  %s470_s25 = scalar_lea.vmem %s314_s24, 2048  ;;  %p475_p11 = scmp.lt.s32.totalorder %s314_s24, %s314_s24 }
  0x24   :  { %p471_p10 = scmp.ne.s32.totalorder %s314_s24, %s470_s25  ;;  %p476_p12 = scmp.lt.s32.totalorder %s470_s25, %s470_s25 }
  0x26   :  { %364 = vmatpush3.bf16.msra.mxu0 %v416_v2  ;;  %401 = vmatpush3.bf16.msra.mxu1 %v416_v2  ;;  %p477_p13 = por %p476_p12, %p475_p11 }
  0x27   :  { %365 = vmatprep.subr.bf16.mxu0 %v417_v3  ;;  %394 = vmatprep.subr.bf16.mxu1 %v417_v3 }
  0x28   :  { %p478_p0 = pnand %p477_p13, %p471_p10 }
  0x2a   :  { %366 = vmatpush3.bf16.msra.mxu0 %v417_v3  ;;  %402 = vmatpush3.bf16.msra.mxu1 %v417_v3 }
  0x2b   :  { %367 = vmatprep.subr.bf16.mxu0 %v418_v6  ;;  %395 = vmatprep.subr.bf16.mxu1 %v418_v6 }
  0x2e   :  { %368 = vmatpush3.bf16.msra.mxu0 %v418_v6  ;;  %403 = vmatpush3.bf16.msra.mxu1 %v418_v6 }
  0x2f   :  { %369 = vmatprep.subr.bf16.mxu0 %v419_v7  ;;  %396 = vmatprep.subr.bf16.mxu1 %v419_v7 }
  0x32   :  { %370 = vmatpush3.bf16.msra.mxu0 %v419_v7  ;;  %404 = vmatpush3.bf16.msra.mxu1 %v419_v7 }
  0x33   :  { %371 = vmatprep.subr.bf16.mxu0 %v420_v8  ;;  %397 = vmatprep.subr.bf16.mxu1 %v420_v8 }
  0x36   :  { %372 = vmatpush3.bf16.msra.mxu0 %v420_v8  ;;  %405 = vmatpush3.bf16.msra.mxu1 %v420_v8 }
  0x37   :  { %373 = vmatprep.subr.bf16.mxu0 %v421_v9  ;;  %398 = vmatprep.subr.bf16.mxu1 %v421_v9 }
  0x3a   :  { %374 = vmatpush3.bf16.msra.mxu0 %v421_v9  ;;  %406 = vmatpush3.bf16.msra.mxu1 %v421_v9 }
  0x3d   :  { %376 = vmatmul.mubr.bf16.vlgmr.msra.gmra.mxu0 %v424_v10  ;;  %384 = vmatmul.mubr.bf16.vlgmr.msra.gmra.mxu1 %v425_v11 }
  0x3e   :  { %379 = vmatprep.mubr.bf16.mxu0 %v426_v12  ;;  %387 = vmatprep.mubr.bf16.mxu1 %v427_v13 }
  0x45   :  { %380 = vmatmul.mubr.bf16.gmra.mxu0 %v428_v14  ;;  %388 = vmatmul.mubr.bf16.gmra.mxu1 %v429_v15 }
  0xfd   :  { %v377_v17 = vpop.f32.mrf.mxu0  ;;  %v385_v18 = vpop.f32.mrf.mxu1 }
  0xfe   :  { %v222_v19 = vadd.f32 %v377_v17, %v326_v16  ;;  %v254_v20 = vadd.f32 %v385_v18, %v326_v16 }
  0xff   :  { %v213_v21 = vpop.f32.mrf.mxu0  ;;  %v245_v22 = vpop.f32.mrf.mxu1 }
 0x100   :  { %v278_v23 = vmax.f32 %v222_v19, 0.0  ;;  %v286_v24 = vmax.f32 %v254_v20, 0.0  ;;  %v214_v25 = vadd.f32 %v326_v16, %v213_v21  ;;  %v246_v26 = vadd.f32 %v326_v16, %v245_v22 }
 0x101   :  { %v378_v27 = vpop.f32.mrf.mxu0  ;;  %v386_v28 = vpop.f32.mrf.mxu1 }
 0x102   :  { %294 = vst [vmem:[#allocation7 + $0x10] sm:$0xff] %v278_v23  ;;  %302 = vst [vmem:[#allocation7 + $0x50] sm:$0xff] %v286_v24  ;;  %v276_v29 = vmax.f32 %v214_v25, 0.0  ;;  %v284_v30 = vmax.f32 %v246_v26, 0.0  ;;  %v225_v31 = vadd.f32 %v378_v27, %v326_v16  ;;  %v257_v32 = vadd.f32 %v386_v28, %v326_v16 }
 0x103   :  { %v216_v33 = vpop.f32.mrf.mxu0  ;;  %v248_v34 = vpop.f32.mrf.mxu1 }
 0x104   :  { %292 = vst [vmem:[#allocation7] sm:$0xff] %v276_v29  ;;  %300 = vst [vmem:[#allocation7 + $0x40] sm:$0xff] %v284_v30  ;;  %v279_v35 = vmax.f32 %v225_v31, 0.0  ;;  %v287_v36 = vmax.f32 %v257_v32, 0.0  ;;  %v217_v37 = vadd.f32 %v326_v16, %v216_v33  ;;  %v249_v38 = vadd.f32 %v326_v16, %v248_v34 }
 0x105   :  { %v381_v39 = vpop.f32.mrf.mxu0  ;;  %v389_v40 = vpop.f32.mrf.mxu1 }
 0x106   :  { %295 = vst [vmem:[#allocation7 + $0x18] sm:$0xff] %v279_v35  ;;  %303 = vst [vmem:[#allocation7 + $0x58] sm:$0xff] %v287_v36  ;;  %v277_v41 = vmax.f32 %v217_v37, 0.0  ;;  %v285_v42 = vmax.f32 %v249_v38, 0.0  ;;  %v238_v43 = vadd.f32 %v381_v39, %v326_v16  ;;  %v270_v44 = vadd.f32 %v389_v40, %v326_v16 }
 0x107   :  { %v229_v45 = vpop.f32.mrf.mxu0  ;;  %v261_v46 = vpop.f32.mrf.mxu1 }
 0x108   :  { %293 = vst [vmem:[#allocation7 + $0x8] sm:$0xff] %v277_v41  ;;  %301 = vst [vmem:[#allocation7 + $0x48] sm:$0xff] %v285_v42  ;;  %v282_v47 = vmax.f32 %v238_v43, 0.0  ;;  %v290_v48 = vmax.f32 %v270_v44, 0.0  ;;  %v230_v49 = vadd.f32 %v326_v16, %v229_v45  ;;  %v262_v50 = vadd.f32 %v326_v16, %v261_v46 }
 0x109   :  { %v382_v51 = vpop.f32.mrf.mxu0  ;;  %v390_v52 = vpop.f32.mrf.mxu1 }
 0x10a   :  { %298 = vst [vmem:[#allocation7 + $0x30] sm:$0xff] %v282_v47  ;;  %306 = vst [vmem:[#allocation7 + $0x70] sm:$0xff] %v290_v48  ;;  %v280_v53 = vmax.f32 %v230_v49, 0.0  ;;  %v288_v54 = vmax.f32 %v262_v50, 0.0  ;;  %v241_v55 = vadd.f32 %v382_v51, %v326_v16  ;;  %v273_v56 = vadd.f32 %v390_v52, %v326_v16 }
 0x10b   :  { %v232_v57 = vpop.f32.mrf.mxu0  ;;  %v264_v58 = vpop.f32.mrf.mxu1 }
 0x10c   :  { %296 = vst [vmem:[#allocation7 + $0x20] sm:$0xff] %v280_v53  ;;  %304 = vst [vmem:[#allocation7 + $0x60] sm:$0xff] %v288_v54  ;;  %v283_v59 = vmax.f32 %v241_v55, 0.0  ;;  %v291_v60 = vmax.f32 %v273_v56, 0.0  ;;  %v233_v61 = vadd.f32 %v326_v16, %v232_v57  ;;  %v265_v62 = vadd.f32 %v326_v16, %v264_v58 }
 0x10e   :  { %299 = vst [vmem:[#allocation7 + $0x38] sm:$0xff] %v283_v59  ;;  %307 = vst [vmem:[#allocation7 + $0x78] sm:$0xff] %v291_v60  ;;  %v281_v63 = vmax.f32 %v233_v61, 0.0  ;;  %v289_v0 = vmax.f32 %v265_v62, 0.0 }
 0x110   :  { %297 = vst [vmem:[#allocation7 + $0x28] sm:$0xff] %v281_v63  ;;  %305 = vst [vmem:[#allocation7 + $0x68] sm:$0xff] %v289_v0 }
 0x111   :  { %481 = shalt.err (!%p478_p0)
}
 0x112   :  { %s501_s26 = smov 128   ;;  %s502_s27 = smov 8  }
 0x113   :  { %319 = dma.vmem_to_hbm [thread:$0]  %s314_s24, 2048, %s538_s3, [#allocation4], %s501_s26, %s501_s26, %s502_s27  }
 0x114   :  { %494 = dma.done.wait [#allocation4], 2048  }
 0x115   :  { %495 = vsyncadd [#allocation4], 4294965248 }
 0x116   :  { %323 = vsyncpa [#allocation3], 1 }
 0x117   :  { %324 = vsyncpa [#allocation6], 1 }
 0x118   :  { %325 = vsyncpa [#allocation4], 1 }

</bundles_post_ra>
